<compile_context>
chip_gen: v6e
topology: v6e:2x2x1
jax: 0.10.0
libtpu: 0.0.40
codegen_flags: <defaults>
</compile_context>

<pallas_src>
import jax
import jax.numpy as jnp
from jax.experimental import pallas as pl
from jax.experimental.pallas import tpu as pltpu


def _round_up(x, m):
    return (x + m - 1) // m * m


def _cdiv(a, b):
    return (a + b - 1) // b


def _vmem_capacity_bytes():
    try:
        return int(pltpu.get_tpu_info().vmem_capacity_bytes)
    except Exception:
        return 64 << 20  # conservative fallback (v7x per-TC size)


def swiglu_kernel(x_ref, w1_ref, b1_ref, w2_ref, b2_ref, o_ref, acc_ref):
    h = pl.program_id(1)

    @pl.when(h == 0)
    def _():
        acc_ref[...] = jnp.zeros_like(acc_ref)

    # fc1 for this hidden block: one fused MXU matmul -> [gate | val], f32 acc.
    gv = jnp.dot(x_ref[...], w1_ref[...],
                 preferred_element_type=jnp.float32) + b1_ref[...]
    th = gv.shape[-1] // 2
    gate = gv[:, :th]
    val = gv[:, th:]

    # SiLU(gate) * val in f32; the divide goes to the EUP (approx reciprocal).
    sig = pl.reciprocal(1.0 + jnp.exp(-gate), approx=True)
    hid = (gate * sig) * val

    # fc2 partial for this hidden block, accumulated in f32 VMEM scratch.
    acc_ref[...] += jnp.dot(hid.astype(w2_ref.dtype), w2_ref[...],
                            preferred_element_type=jnp.float32)

    @pl.when(h == pl.num_programs(1) - 1)
    def _():
        o_ref[...] = (acc_ref[...] + b2_ref[...]).astype(o_ref.dtype)


def prepare_swiglu_params(wg, bg, wx, bx, w2, b2, *, matmul_dtype=None,
                          th_max=1024, tm_hint=256):
    """One-time weight fuse / pad / interleave (hoisted out of the forward path).

    wg/wx: (C_in, H) (already transposed from PyTorch's (H, C_in)); w2: (H, C_out).
    Call once at module init; pass the returned dict to swiglu_pallas per forward.
    """
    C_in, H = wg.shape
    C_out = w2.shape[1]

    if matmul_dtype is None:
        # Production default: bf16 MXU inputs (full MXU rate), f32 accumulation.
        matmul_dtype = jnp.bfloat16 if wg.dtype == jnp.float32 else wg.dtype
    mm_dtype = jnp.dtype(matmul_dtype)
    mm_isz = mm_dtype.itemsize

    # Lane-dense feature dims (multiples of 128 -> unmasked stores, clean MXU tiles).
    C_in_p = _round_up(C_in, 128)
    C_out_p = _round_up(C_out, 128)
    H_p = _round_up(H, 128)

    # Hidden-dim block size: stream W1/W2 blocks over a trailing reduction axis
    # so double-buffered weight blocks + f32 intermediates fit the per-core
    # VMEM budget (64 MiB on v7x, 128 MiB on v5e/v6e).
    budget = int(0.5 * 0.85 * _vmem_capacity_bytes())
    th = min(th_max, H_p)
    while th > 128:
        w_blk = 2 * (C_in_p * 2 * th + th * C_out_p) * mm_isz  # 2x-buffered W1/W2
        inter = 4 * tm_hint * 2 * th * 4                       # live f32 slabs
        if w_blk + inter <= budget:
            break
        th -= 128
    th = max(th, 128)
    nH = _cdiv(H_p, th)
    th = _round_up(_cdiv(H_p, nH), 128)
    H_pad = nH * th

    f32 = jnp.float32
    wg_p = jnp.zeros((C_in_p, H_pad), f32).at[:C_in, :H].set(wg.astype(f32))
    wx_p = jnp.zeros((C_in_p, H_pad), f32).at[:C_in, :H].set(wx.astype(f32))
    bg_p = jnp.zeros((H_pad,), f32).at[:H].set(bg.astype(f32))
    bx_p = jnp.zeros((H_pad,), f32).at[:H].set(bx.astype(f32))

    # Interleave gate|val per hidden block so each (C_in_p, 2*th) W1 block and
    # its (1, 2*th) bias block carry matching gate+val columns.
    w1 = jnp.stack(
        [wg_p.reshape(C_in_p, nH, th), wx_p.reshape(C_in_p, nH, th)], axis=2
    ).reshape(C_in_p, 2 * H_pad).astype(mm_dtype)
    b1 = jnp.stack(
        [bg_p.reshape(nH, th), bx_p.reshape(nH, th)], axis=1
    ).reshape(1, 2 * H_pad)  # stays f32

    w2_p = jnp.zeros((H_pad, C_out_p), mm_dtype).at[:H, :C_out].set(
        w2.astype(mm_dtype))
    b2_p = jnp.zeros((1, C_out_p), f32).at[0, :C_out].set(b2.astype(f32))

    return {
        "w1": w1, "b1": b1, "w2": w2_p, "b2": b2_p,
        "C_in": C_in, "C_out": C_out,
        "C_in_p": C_in_p, "C_out_p": C_out_p,
        "H_pad": H_pad, "th": th, "nH": nH,
        "mm_dtype": mm_dtype,
    }


def swiglu_pallas(x, params, *, tm=256):
    """x: (B, N, C_in). params: output of prepare_swiglu_params (pre-fused/padded)."""
    B, N, C_in = x.shape
    assert C_in == params["C_in"], "x feature dim does not match prepared params"
    C_out = params["C_out"]
    C_in_p, C_out_p = params["C_in_p"], params["C_out_p"]
    H_pad, th, nH = params["H_pad"], params["th"], params["nH"]
    mm_dtype = params["mm_dtype"]
    mm_isz = mm_dtype.itemsize
    out_dtype = x.dtype
    out_isz = jnp.dtype(out_dtype).itemsize

    T = B * N
    sub = 16 if mm_isz < 4 else 8          # sublane multiple (bf16 vs f32)
    tm_eff = min(_round_up(tm, sub), _round_up(T, sub))
    T_pad = _round_up(T, tm_eff)

    # Fast path: no activation zero-pad copy when shapes already line up.
    x2d = x.reshape(T, C_in)
    if T_pad == T and C_in_p == C_in:
        x2d = x2d.astype(mm_dtype)
    else:
        x2d = (jnp.zeros((T_pad, C_in_p), mm_dtype)
               .at[:T, :C_in].set(x2d.astype(mm_dtype)))

    # Constant-index operands don't benefit from double buffering.
    w_mode = pl.Buffered(buffer_count=1) if nH == 1 else None
    b2_mode = pl.Buffered(buffer_count=1)

    # Generation-aware VMEM budget: cap at 85% of per-core physical capacity.
    cap = _vmem_capacity_bytes()
    nbuf_w = 1 if nH == 1 else 2
    need = (2 * tm_eff * C_in_p * mm_isz                          # x double-buffer
            + nbuf_w * (C_in_p * 2 * th + th * C_out_p) * mm_isz  # W1/W2 blocks
            + nbuf_w * 2 * th * 4 + C_out_p * 4                   # biases
            + 2 * tm_eff * C_out_p * out_isz                      # out double-buffer
            + tm_eff * C_out_p * 4                                # acc scratch
            + 4 * tm_eff * 2 * th * 4)                            # live f32 slabs
    vmem_limit = int(min(int(0.85 * cap),
                         max(32 << 20, int(1.3 * need) + (4 << 20))))

    n_row = T_pad // tm_eff
    weight_bytes = ((C_in_p * 2 * H_pad + H_pad * C_out_p) * mm_isz
                    + (2 * H_pad + C_out_p) * 4)
    cost = pl.CostEstimate(
        flops=2 * T_pad * (C_in_p * 2 * H_pad + H_pad * C_out_p),
        transcendentals=T_pad * H_pad,
        bytes_accessed=(T_pad * C_in_p * mm_isz
                        + (weight_bytes if nH == 1 else n_row * weight_bytes)
                        + T_pad * C_out_p * out_isz),
    )

    out2d = pl.pallas_call(
        swiglu_kernel,
        out_shape=jax.ShapeDtypeStruct((T_pad, C_out_p), out_dtype),
        grid_spec=pltpu.PrefetchScalarGridSpec(
            num_scalar_prefetch=0,
            grid=(n_row, nH),                                      # rows parallel, H reduction last
            in_specs=[
                pl.BlockSpec((tm_eff, C_in_p), lambda i, h: (i, 0)),       # x rows
                pl.BlockSpec((C_in_p, 2 * th), lambda i, h: (0, h),
                             pipeline_mode=w_mode),                        # [Wg|Wx] block
                pl.BlockSpec((1, 2 * th), lambda i, h: (0, h),
                             pipeline_mode=w_mode),                        # [bg|bx] block
                pl.BlockSpec((th, C_out_p), lambda i, h: (h, 0),
                             pipeline_mode=w_mode),                        # W2 block
                pl.BlockSpec((1, C_out_p), lambda i, h: (0, 0),
                             pipeline_mode=b2_mode),                       # b2 (resident)
            ],
            out_specs=pl.BlockSpec((tm_eff, C_out_p), lambda i, h: (i, 0)),
            scratch_shapes=[pltpu.VMEM((tm_eff, C_out_p), jnp.float32)],
        ),
        compiler_params=pltpu.CompilerParams(
            dimension_semantics=("parallel", "arbitrary"),
            vmem_limit_bytes=vmem_limit,
        ),
        cost_estimate=cost,
    )(x2d, params["w1"], params["b1"], params["w2"], params["b2"])

    # Fast path: skip the slice-copy when no padding was applied.
    if T_pad == T and C_out_p == C_out:
        return out2d.reshape(B, N, C_out)
    return out2d[:T, :C_out].reshape(B, N, C_out)


def swiglu_reference(x, wg, bg, wx, bx, w2, b2):
    gate = jnp.einsum("bnc,ch->bnh", x, wg) + bg
    val = jnp.einsum("bnc,ch->bnh", x, wx) + bx
    return jnp.einsum("bnh,ho->bno", jax.nn.silu(gate) * val, w2) + b2


if __name__ == "__main__":
    # Small shapes consistent with the module (transformer block tokens).
    B, N = 2, 8                  # batch, sequence length -> 16 tokens
    C_in, H, C_out = 32, 64, 32  # in_features, hidden_features, out_features

    key = jax.random.PRNGKey(0)
    kx, kg, kbg, kxx, kbx, k2, kb2 = jax.random.split(key, 7)

    x = jax.random.normal(kx, (B, N, C_in), dtype=jnp.float32)

    # PyTorch stores W as (out, in); we keep the transposed (in, out) layout.
    wg = jax.random.normal(kg, (C_in, H), dtype=jnp.float32) * 0.02
    bg = jax.random.normal(kbg, (H,), dtype=jnp.float32) * 0.02
    wx = jax.random.normal(kxx, (C_in, H), dtype=jnp.float32) * 0.02
    bx = jax.random.normal(kbx, (H,), dtype=jnp.float32) * 0.02
    w2 = jax.random.normal(k2, (H, C_out), dtype=jnp.float32) * 0.02
    b2 = jax.random.normal(kb2, (C_out,), dtype=jnp.float32) * 0.02

    ref = swiglu_reference(x, wg, bg, wx, bx, w2, b2)

    # f32-MXU path (explicit): near-exact vs reference (sigmoid uses EUP approx recip).
    params_f32 = prepare_swiglu_params(wg, bg, wx, bx, w2, b2,
                                       matmul_dtype=jnp.float32)
    out = jax.block_until_ready(swiglu_pallas(x, params_f32))
    assert out.shape == (B, N, C_out)
    assert jnp.allclose(out, ref, atol=1e-4, rtol=1e-3), "f32 mismatch vs reference"

    # Default production path: bf16 MXU matmuls, f32 accumulation + f32 SiLU.
    params_bf16 = prepare_swiglu_params(wg, bg, wx, bx, w2, b2)
    out_bf16 = jax.block_until_ready(swiglu_pallas(x, params_bf16))
    assert out_bf16.shape == (B, N, C_out)
    assert jnp.allclose(out_bf16.astype(jnp.float32), ref, atol=1e-2, rtol=1e-1), \
        "bf16 mismatch vs reference"

    # TODO(synk): dropout (drop>0) and optional norm_layer are Identity here
    # (module defaults / inference); not implemented in-kernel.
    print("KERNEL_OK")
</pallas_src>

<mosaic_0001>
module attributes {stable_mosaic.version = 11 : i64} {
  func.func @swiglu_kernel(%arg0: i32, %arg1: i32, %arg2: memref<16x128xf32, #tpu.memory_space<vmem>>, %arg3: memref<128x256xf32, #tpu.memory_space<vmem>>, %arg4: memref<1x256xf32, #tpu.memory_space<vmem>>, %arg5: memref<128x128xf32, #tpu.memory_space<vmem>>, %arg6: memref<1x128xf32, #tpu.memory_space<vmem>>, %arg7: memref<16x128xf32, #tpu.memory_space<vmem>>, %arg8: memref<16x128xf32, #tpu.memory_space<vmem>>) attributes {dimension_semantics = [#tpu.dimension_semantics<parallel>, #tpu.dimension_semantics<arbitrary>], iteration_bounds = array<i64: 1, 1>, scalar_prefetch = 0 : i64, scratch_operands = 1 : i64, tpu.core_type = #tpu.core_type<tc>, window_params = [{transform_indices = @transform_0, window_bounds = array<i64: 16, 128>}, {pipeline_mode = #tpu.pipeline_mode<synchronous>, transform_indices = @transform_1, window_bounds = array<i64: 128, 256>}, {pipeline_mode = #tpu.pipeline_mode<synchronous>, transform_indices = @transform_2, window_bounds = array<i64: 1, 256>}, {pipeline_mode = #tpu.pipeline_mode<synchronous>, transform_indices = @transform_3, window_bounds = array<i64: 128, 128>}, {pipeline_mode = #tpu.pipeline_mode<synchronous>, transform_indices = @transform_4, window_bounds = array<i64: 1, 128>}, {transform_indices = @transform_5, window_bounds = array<i64: 16, 128>}]} {
    %c0_i32 = arith.constant 0 : i32
    %0 = arith.cmpi eq, %arg1, %c0_i32 : i32
    %1 = arith.extui %0 : i1 to i32
    %c0_i32_0 = arith.constant 0 : i32
    %2 = arith.cmpi ne, %1, %c0_i32_0 : i32
    scf.if %2 {
      %cst_17 = arith.constant 0.000000e+00 : f32
      %27 = vector.broadcast %cst_17 : f32 to vector<16x128xf32>
      %c0_18 = arith.constant 0 : index
      %c0_19 = arith.constant 0 : index
      %28 = vector.load %arg8[%c0_18, %c0_19] : memref<16x128xf32, #tpu.memory_space<vmem>>, vector<16x128xf32>
      tpu.vector_store %arg8[%c0_18, %c0_19], %27 {strides = array<i32>} : memref<16x128xf32, #tpu.memory_space<vmem>>, vector<16x128xf32>,
    } else {
    }
    %c0 = arith.constant 0 : index
    %c0_1 = arith.constant 0 : index
    %3 = vector.load %arg2[%c0, %c0_1] : memref<16x128xf32, #tpu.memory_space<vmem>>, vector<16x128xf32>
    %c0_2 = arith.constant 0 : index
    %c0_3 = arith.constant 0 : index
    %4 = vector.load %arg3[%c0_2, %c0_3] : memref<128x256xf32, #tpu.memory_space<vmem>>, vector<128x256xf32>
    %cst = arith.constant dense<0.000000e+00> : vector<16x256xf32>
    %5 = tpu.matmul %3, %4, %cst {dimension_numbers = #tpu.dot_dimension_numbers<[1], [0], [0], [1], [0, 0, 1, 1], [], []>} : vector<16x128xf32>, vector<128x256xf32>, vector<16x256xf32> -> vector<16x256xf32>
    %c0_4 = arith.constant 0 : index
    %c0_5 = arith.constant 0 : index
    %6 = vector.load %arg4[%c0_4, %c0_5] : memref<1x256xf32, #tpu.memory_space<vmem>>, vector<1x256xf32>
    %7 = vector.broadcast %6 : vector<1x256xf32> to vector<16x256xf32>
    %8 = arith.addf %5, %7 : vector<16x256xf32>
    %9 = vector.extract_strided_slice %8 {offsets = [0, 0], sizes = [16, 128], strides = [1, 1]} : vector<16x256xf32> to vector<16x128xf32>
    %10 = vector.extract_strided_slice %8 {offsets = [0, 128], sizes = [16, 128], strides = [1, 1]} : vector<16x256xf32> to vector<16x128xf32>
    %cst_6 = arith.constant 0.000000e+00 : f32
    %11 = vector.broadcast %cst_6 : f32 to vector<16x128xf32>
    %12 = arith.subf %11, %9 : vector<16x128xf32>
    %13 = math.exp %12 : vector<16x128xf32>
    %cst_7 = arith.constant 1.000000e+00 : f32
    %14 = vector.broadcast %cst_7 : f32 to vector<16x128xf32>
    %15 = arith.addf %14, %13 : vector<16x128xf32>
    %16 = tpu.reciprocal %15 {approx = true} : vector<16x128xf32> -> vector<16x128xf32>
    %17 = arith.mulf %9, %16 : vector<16x128xf32>
    %18 = arith.mulf %17, %10 : vector<16x128xf32>
    %c0_8 = arith.constant 0 : index
    %c0_9 = arith.constant 0 : index
    %19 = vector.load %arg8[%c0_8, %c0_9] : memref<16x128xf32, #tpu.memory_space<vmem>>, vector<16x128xf32>
    %c0_10 = arith.constant 0 : index
    %c0_11 = arith.constant 0 : index
    %20 = vector.load %arg5[%c0_10, %c0_11] : memref<128x128xf32, #tpu.memory_space<vmem>>, vector<128x128xf32>
    %cst_12 = arith.constant dense<0.000000e+00> : vector<16x128xf32>
    %21 = tpu.matmul %18, %20, %cst_12 {dimension_numbers = #tpu.dot_dimension_numbers<[1], [0], [0], [1], [0, 0, 1, 1], [], []>} : vector<16x128xf32>, vector<128x128xf32>, vector<16x128xf32> -> vector<16x128xf32>
    %22 = arith.addf %19, %21 : vector<16x128xf32>
    %c0_13 = arith.constant 0 : index
    %c0_14 = arith.constant 0 : index
    %23 = vector.load %arg8[%c0_13, %c0_14] : memref<16x128xf32, #tpu.memory_space<vmem>>, vector<16x128xf32>
    tpu.vector_store %arg8[%c0_13, %c0_14], %22 {strides = array<i32>} : memref<16x128xf32, #tpu.memory_space<vmem>>, vector<16x128xf32>,
    %c0_i32_15 = arith.constant 0 : i32
    %24 = arith.cmpi eq, %arg1, %c0_i32_15 : i32
    %25 = arith.extui %24 : i1 to i32
    %c0_i32_16 = arith.constant 0 : i32
    %26 = arith.cmpi ne, %25, %c0_i32_16 : i32
    scf.if %26 {
      %c0_17 = arith.constant 0 : index
      %c0_18 = arith.constant 0 : index
      %27 = vector.load %arg8[%c0_17, %c0_18] : memref<16x128xf32, #tpu.memory_space<vmem>>, vector<16x128xf32>
      %c0_19 = arith.constant 0 : index
      %c0_20 = arith.constant 0 : index
      %28 = vector.load %arg6[%c0_19, %c0_20] : memref<1x128xf32, #tpu.memory_space<vmem>>, vector<1x128xf32>
      %29 = vector.broadcast %28 : vector<1x128xf32> to vector<16x128xf32>
      %30 = arith.addf %27, %29 : vector<16x128xf32>
      %c0_21 = arith.constant 0 : index
      %c0_22 = arith.constant 0 : index
      %31 = vector.load %arg7[%c0_21, %c0_22] : memref<16x128xf32, #tpu.memory_space<vmem>>, vector<16x128xf32>
      tpu.vector_store %arg7[%c0_21, %c0_22], %30 {strides = array<i32>} : memref<16x128xf32, #tpu.memory_space<vmem>>, vector<16x128xf32>,
    } else {
    }
    return
  }
  func.func @transform_0(%arg0: i32, %arg1: i32) -> (i32, i32) {
    %c0_i32 = arith.constant 0 : i32
    %c0_i32_0 = arith.constant 0 : i32
    return %arg0, %c0_i32 : i32, i32
  }
  func.func @transform_1(%arg0: i32, %arg1: i32) -> (i32, i32) {
    %c0_i32 = arith.constant 0 : i32
    %c0_i32_0 = arith.constant 0 : i32
    return %c0_i32, %arg1 : i32, i32
  }
  func.func @transform_2(%arg0: i32, %arg1: i32) -> (i32, i32) {
    %c0_i32 = arith.constant 0 : i32
    %c0_i32_0 = arith.constant 0 : i32
    return %c0_i32, %arg1 : i32, i32
  }
  func.func @transform_3(%arg0: i32, %arg1: i32) -> (i32, i32) {
    %c0_i32 = arith.constant 0 : i32
    %c0_i32_0 = arith.constant 0 : i32
    return %arg1, %c0_i32 : i32, i32
  }
  func.func @transform_4(%arg0: i32, %arg1: i32) -> (i32, i32) {
    %c0_i32 = arith.constant 0 : i32
    %c0_i32_0 = arith.constant 0 : i32
    %c0_i32_1 = arith.constant 0 : i32
    return %c0_i32, %c0_i32_0 : i32, i32
  }
  func.func @transform_5(%arg0: i32, %arg1: i32) -> (i32, i32) {
    %c0_i32 = arith.constant 0 : i32
    %c0_i32_0 = arith.constant 0 : i32
    return %arg0, %c0_i32 : i32, i32
  }
}

</mosaic_0001>

<bundles_post_ra>
// kernel: tpu_custom_call.1
= control target key start
LH: loop header
LB: loop body
LE: loop exit
PB: predicated region body
PF: predicated region fallthrough
CT: control target
= control target key end

     0   :  { %10 = vsyncpa [#allocation4], 0  ;;  %s561_s0 = inlined_call_operand.hbm [shape: f32[16,128], index: 0, kind: input, shape index: {}]   ;;  %s562_s1 = inlined_call_operand.hbm [shape: f32[128,256], index: 1, kind: input, shape index: {}]   ;;  %s563_s2 = inlined_call_operand.vmem [shape: f32[1,256], index: 2, kind: input, shape index: {}]   ;;  %s564_s3 = inlined_call_operand.hbm [shape: f32[128,128], index: 3, kind: input, shape index: {}]   ;;  %s565_s4 = inlined_call_operand.vmem [shape: f32[1,128], index: 4, kind: input, shape index: {}]   ;;  %s566_s5 = inlined_call_operand.hbm [shape: f32[16,128], index: 5, kind: output, shape index: {}]  }
   0x1   :  { %11 = vsyncpa [#allocation7], 0 }
   0x2   :  { %12 = vsyncpa [#allocation5], 0  ;;  %s493_s18 = smov [#allocation6]  }
   0x3   :  { %s30_s19 = sshll.u32 %s493_s18, 4  ;;  %s31_s19 = int_to_ptr.vmem [resolvable:$true] %s30_s19 }
   0x4   :  { %s415_s20 = scalar_lea.vmem %s31_s19, 4096  ;;  %p420_p1 = scmp.lt.s32.totalorder %s31_s19, %s31_s19 }
   0x5   :  { %p416_p0 = scmp.ne.s32.totalorder %s31_s19, %s415_s20  ;;  %p421_p2 = scmp.lt.s32.totalorder %s415_s20, %s415_s20 }
   0x7   :  { %p422_p3 = por %p421_p2, %p420_p1 }
   0x9   :  { %p423_p4 = pnand %p422_p3, %p416_p0 }
   0xb   :  { %426 = shalt.err (!%p423_p4)
}
   0xc   :  { %s494_s21 = smov 256   ;;  %s495_s22 = smov 16  }
   0xd   :  { %36 = dma.hbm_to_vmem [thread:$0]  %s562_s1, 4096, %s31_s19, [#allocation7], %s494_s21, %s494_s21, %s495_s22  }
   0xe   :  { %s496_s25 = smov [#allocation3]  }
   0xf   :  { %s18_s26 = sshll.u32 %s496_s25, 4  ;;  %s19_s26 = int_to_ptr.vmem [resolvable:$true] %s18_s26 }
  0x10   :  { %s435_s27 = scalar_lea.vmem %s19_s26, 256  ;;  %p440_p6 = scmp.lt.s32.totalorder %s19_s26, %s19_s26 }
  0x11   :  { %p436_p5 = scmp.ne.s32.totalorder %s19_s26, %s435_s27  ;;  %p441_p7 = scmp.lt.s32.totalorder %s435_s27, %s435_s27 }
  0x13   :  { %p442_p8 = por %p441_p7, %p440_p6 }
  0x15   :  { %p443_p9 = pnand %p442_p8, %p436_p5 }
  0x17   :  { %446 = shalt.err (!%p443_p9)
}
  0x18   :  { %s497_s28 = smov 128   ;;  %s498_s29 = smov 8  }
  0x19   :  { %24 = dma.hbm_to_vmem [thread:$0]  %s561_s0, 256, %s19_s26, [#allocation4], %s497_s28, %s497_s28, %s498_s29  }
  0x1a   :  { %s499_s1 = smov [#allocation8]  }
  0x1b   :  { %s44_s7 = sshll.u32 %s499_s1, 4  ;;  %s45_s7 = int_to_ptr.vmem [resolvable:$true] %s44_s7 }
  0x1c   :  { %s455_s8 = scalar_lea.vmem %s45_s7, 2048  ;;  %p460_p11 = scmp.lt.s32.totalorder %s45_s7, %s45_s7 }
  0x1d   :  { %p456_p10 = scmp.ne.s32.totalorder %s45_s7, %s455_s8  ;;  %p461_p12 = scmp.lt.s32.totalorder %s455_s8, %s455_s8 }
  0x1f   :  { %p462_p13 = por %p461_p12, %p460_p11 }
  0x21   :  { %p463_p0 = pnand %p462_p13, %p456_p10 }
  0x23   :  { %466 = shalt.err (!%p463_p0)
}
  0x24   :  { %50 = dma.hbm_to_vmem [thread:$0]  %s564_s3, 2048, %s45_s7, [#allocation7], %s497_s28, %s497_s28, %s498_s29  }
  0x25   :  { %487 = dma.done.wait [#allocation4], 256  }
  0x26   :  { %488 = vsyncadd [#allocation4], 4294967040 }
  0x27   :  { %489 = dma.done.wait [#allocation7], 6144  }
  0x28   :  { %490 = vsyncadd [#allocation7], 4294961152  ;;  %v500_v0 = vmov 0.0   ;;  %v101_v1 = vld [vmem:[#allocation6 + $0xf8] sm:$0xff]  ;;  %v100_v2 = vld [vmem:[#allocation6 + $0xf0] sm:$0xff]  ;;  %v104_v51 = vlaneseq  ;;  %s501_s12 = smov [#allocation9]  }
  0x29   :  { %178 = vmatprep.mubr.f32.mxu0 %v500_v0  ;;  %v99_v3 = vld [vmem:[#allocation6 + $0xe8] sm:$0xff]  ;;  %114 = vmatprep.subr.mxu0 %v101_v1  ;;  %v98_v4 = vld [vmem:[#allocation6 + $0xe0] sm:$0xff]  ;;  %v97_v5 = vld [vmem:[#allocation6 + $0xd8] sm:$0xff]  ;;  %s323_s13 = sshll.u32 %s501_s12, 4  ;;  %s324_s13 = int_to_ptr.vmem [resolvable:$true] %s323_s13 }
  0x2a   :  { %115 = vmatpush1.msra.mxu0 %v100_v2  ;;  %v96_v6 = vld [vmem:[#allocation6 + $0xd0] sm:$0xff]  ;;  %v95_v7 = vld [vmem:[#allocation6 + $0xc8] sm:$0xff]  ;;  %v94_v8 = vld [vmem:[#allocation6 + $0xc0] sm:$0xff]  ;;  %v105_v52 = vshrl.u32 %v104_v51, 7  ;;  %s467_s14 = scalar_lea.vmem %s324_s13, 256  ;;  %p472_p2 = scmp.lt.s32.totalorder %s324_s13, %s324_s13 }
  0x2b   :  { %116 = vmatprep.subr.mxu0 %v99_v3  ;;  %v93_v9 = vld [vmem:[#allocation6 + $0xb8] sm:$0xff]  ;;  %v92_v10 = vld [vmem:[#allocation6 + $0xb0] sm:$0xff]  ;;  %v91_v11 = vld [vmem:[#allocation6 + $0xa8] sm:$0xff]  ;;  %p468_p1 = scmp.ne.s32.totalorder %s324_s13, %s467_s14  ;;  %p473_p3 = scmp.lt.s32.totalorder %s467_s14, %s467_s14 }
  0x2c   :  { %117 = vmatpush1.msra.mxu0 %v98_v4  ;;  %v90_v12 = vld [vmem:[#allocation6 + $0xa0] sm:$0xff]  ;;  %v89_v13 = vld [vmem:[#allocation6 + $0x98] sm:$0xff]  ;;  %v88_v14 = vld [vmem:[#allocation6 + $0x90] sm:$0xff]  ;;  %v106_v53 = vsub.s32 0, %v105_v52 }
  0x2d   :  { %118 = vmatprep.subr.mxu0 %v97_v5  ;;  %v87_v15 = vld [vmem:[#allocation6 + $0x88] sm:$0xff]  ;;  %v86_v16 = vld [vmem:[#allocation6 + $0x80] sm:$0xff]  ;;  %v85_v17 = vld [vmem:[#allocation6 + $0x78] sm:$0xff]  ;;  %v110_v5 = vsub.s32 1, %v105_v52  ;;  %p474_p4 = por %p473_p3, %p472_p2 }
  0x2e   :  { %119 = vmatpush1.msra.mxu0 %v96_v6  ;;  %v84_v18 = vld [vmem:[#allocation6 + $0x70] sm:$0xff]  ;;  %v83_v19 = vld [vmem:[#allocation6 + $0x68] sm:$0xff]  ;;  %v82_v20 = vld [vmem:[#allocation6 + $0x60] sm:$0xff] }
  0x2f   :  { %120 = vmatprep.subr.mxu0 %v95_v7  ;;  %v81_v21 = vld [vmem:[#allocation6 + $0x58] sm:$0xff]  ;;  %v80_v22 = vld [vmem:[#allocation6 + $0x50] sm:$0xff]  ;;  %v79_v23 = vld [vmem:[#allocation6 + $0x48] sm:$0xff]  ;;  %p475_p5 = pnand %p474_p4, %p468_p1 }
  0x30   :  { %121 = vmatpush1.msra.mxu0 %v94_v8  ;;  %v78_v24 = vld [vmem:[#allocation6 + $0x40] sm:$0xff]  ;;  %v77_v25 = vld [vmem:[#allocation6 + $0x38] sm:$0xff]  ;;  %v76_v26 = vld [vmem:[#allocation6 + $0x30] sm:$0xff] }
  0x31   :  { %122 = vmatprep.subr.mxu0 %v93_v9  ;;  %v75_v27 = vld [vmem:[#allocation6 + $0x28] sm:$0xff]  ;;  %v74_v28 = vld [vmem:[#allocation6 + $0x20] sm:$0xff]  ;;  %v73_v29 = vld [vmem:[#allocation6 + $0x18] sm:$0xff] }
  0x32   :  { %123 = vmatpush1.msra.mxu0 %v92_v10  ;;  %v72_v30 = vld [vmem:[#allocation6 + $0x10] sm:$0xff]  ;;  %v71_v31 = vld [vmem:[#allocation6 + $0x8] sm:$0xff]  ;;  %v70_v32 = vld [vmem:[#allocation6] sm:$0xff] }
  0x33   :  { %124 = vmatprep.subr.mxu0 %v91_v11  ;;  %v68_v33 = vld [vmem:[#allocation3] sm:$0xff]  ;;  %v69_v34 = vld [vmem:[#allocation3 + $0x8] sm:$0xff]  ;;  %v220_v37 = vld [vmem:[#allocation8 + $0x68] sm:$0xff] }
  0x34   :  { %125 = vmatpush1.msra.mxu0 %v90_v12  ;;  %v222_v35 = vld [vmem:[#allocation8 + $0x78] sm:$0xff]  ;;  %v221_v36 = vld [vmem:[#allocation8 + $0x70] sm:$0xff]  ;;  %v219_v38 = vld [vmem:[#allocation8 + $0x60] sm:$0xff] }
  0x35   :  { %126 = vmatprep.subr.mxu0 %v89_v13  ;;  %355 = vmatprep.subr.mxu1 %v222_v35  ;;  %v218_v39 = vld [vmem:[#allocation8 + $0x58] sm:$0xff]  ;;  %v217_v40 = vld [vmem:[#allocation8 + $0x50] sm:$0xff]  ;;  %v216_v41 = vld [vmem:[#allocation8 + $0x48] sm:$0xff] }
  0x36   :  { %127 = vmatpush1.msra.mxu0 %v88_v14  ;;  %356 = vmatpush3.msra.mxu1 %v222_v35  ;;  %v215_v42 = vld [vmem:[#allocation8 + $0x40] sm:$0xff]  ;;  %v214_v43 = vld [vmem:[#allocation8 + $0x38] sm:$0xff]  ;;  %v213_v44 = vld [vmem:[#allocation8 + $0x30] sm:$0xff] }
  0x37   :  { %128 = vmatprep.subr.mxu0 %v87_v15  ;;  %357 = vmatprep.subr.mxu1 %v221_v36  ;;  %v212_v45 = vld [vmem:[#allocation8 + $0x28] sm:$0xff]  ;;  %v211_v46 = vld [vmem:[#allocation8 + $0x20] sm:$0xff]  ;;  %v210_v47 = vld [vmem:[#allocation8 + $0x18] sm:$0xff] }
  0x38   :  { %129 = vmatpush1.msra.mxu0 %v86_v16  ;;  %358 = vmatpush3.msra.mxu1 %v221_v36  ;;  %v209_v48 = vld [vmem:[#allocation8 + $0x10] sm:$0xff]  ;;  %v208_v49 = vld [vmem:[#allocation8 + $0x8] sm:$0xff]  ;;  %v207_v50 = vld [vmem:[#allocation8] sm:$0xff] }
  0x39   :  { %130 = vmatprep.subr.mxu0 %v85_v17  ;;  %359 = vmatprep.subr.mxu1 %v220_v37  ;;  %v102_v54 = vld [vmem:[%s563_s2] sm:$0x3] }
  0x3a   :  { %131 = vmatpush1.msra.mxu0 %v84_v18  ;;  %360 = vmatpush3.msra.mxu1 %v220_v37  ;;  %v107_v55 = vrot.slane %v102_v54, %v106_v53  ;;  %v111_v6 = vrot.slane %v102_v54, %v110_v5  ;;  %v336_v16 = vld [vmem:[%s565_s4] ss:$0 sm:$0xff] }
  0x3b   :  { %132 = vmatprep.subr.mxu0 %v83_v19  ;;  %361 = vmatprep.subr.mxu1 %v219_v38 }
  0x3c   :  { %133 = vmatpush1.msra.mxu0 %v82_v20  ;;  %362 = vmatpush3.msra.mxu1 %v219_v38 }
  0x3d   :  { %134 = vmatprep.subr.mxu0 %v81_v21  ;;  %363 = vmatprep.subr.mxu1 %v218_v39 }
  0x3e   :  { %135 = vmatpush1.msra.mxu0 %v80_v22  ;;  %364 = vmatpush3.msra.mxu1 %v218_v39 }
  0x3f   :  { %136 = vmatprep.subr.mxu0 %v79_v23  ;;  %365 = vmatprep.subr.mxu1 %v217_v40 }
  0x40   :  { %137 = vmatpush1.msra.mxu0 %v78_v24  ;;  %366 = vmatpush3.msra.mxu1 %v217_v40 }
  0x41   :  { %138 = vmatprep.subr.mxu0 %v77_v25  ;;  %367 = vmatprep.subr.mxu1 %v216_v41 }
  0x42   :  { %139 = vmatpush1.msra.mxu0 %v76_v26  ;;  %368 = vmatpush3.msra.mxu1 %v216_v41 }
  0x43   :  { %140 = vmatprep.subr.mxu0 %v75_v27  ;;  %369 = vmatprep.subr.mxu1 %v215_v42 }
  0x44   :  { %141 = vmatpush1.msra.mxu0 %v74_v28  ;;  %370 = vmatpush3.msra.mxu1 %v215_v42 }
  0x45   :  { %142 = vmatprep.subr.mxu0 %v73_v29  ;;  %371 = vmatprep.subr.mxu1 %v214_v43 }
  0x46   :  { %143 = vmatpush1.msra.mxu0 %v72_v30  ;;  %372 = vmatpush3.msra.mxu1 %v214_v43 }
  0x47   :  { %144 = vmatprep.subr.mxu0 %v71_v31  ;;  %373 = vmatprep.subr.mxu1 %v213_v44 }
  0x48   :  { %145 = vmatpush1.msra.mxu0 %v70_v32  ;;  %374 = vmatpush3.msra.mxu1 %v213_v44 }
  0x49   :  { %179 = vmatmul.mubr.f32.vlgmr.msra.gmra.mxu0 %v68_v33  ;;  %375 = vmatprep.subr.mxu1 %v212_v45 }
  0x4a   :  { %184 = vmatprep.mubr.f32.mxu0 %v500_v0  ;;  %376 = vmatpush3.msra.mxu1 %v212_v45 }
  0x4b   :  { %377 = vmatprep.subr.mxu1 %v211_v46 }
  0x4c   :  { %378 = vmatpush3.msra.mxu1 %v211_v46 }
  0x4d   :  { %185 = vmatmul.mubr.f32.gmra.mxu0 %v69_v34  ;;  %379 = vmatprep.subr.mxu1 %v210_v47 }
  0x4e   :  { %380 = vmatpush3.msra.mxu1 %v210_v47 }
  0x4f   :  { %381 = vmatprep.subr.mxu1 %v209_v48 }
  0x50   :  { %382 = vmatpush3.msra.mxu1 %v209_v48 }
  0x51   :  { %383 = vmatprep.subr.mxu1 %v208_v49 }
  0x52   :  { %384 = vmatpush3.msra.mxu1 %v208_v49 }
  0x53   :  { %385 = vmatprep.subr.mxu1 %v207_v50 }
  0x54   :  { %386 = vmatpush3.msra.mxu1 %v207_v50 }
 0x109   :  { %v180_v56 = vpop.f32.mrf.mxu0 }
 0x10a   :  { %v181_v57 = vadd.f32 %v180_v56, %v107_v55 }
 0x10b   :  { %v182_v58 = vpop.f32.mrf.mxu0 }
 0x10c   :  { %v191_v59 = vsub.f32 0.0, %v181_v57  ;;  %v183_v8 = vadd.f32 %v182_v58, %v111_v6 }
 0x10d   :  { %v186_v60 = vpop.f32.mrf.mxu0 }
 0x10e   :  { %v193_v61 = vmul.f32 1.442695, %v191_v59  ;;  %v187_v62 = vadd.f32 %v186_v60, %v107_v55 }
 0x10f   :  { %v188_v10 = vpop.f32.mrf.mxu0 }
 0x110   :  { %399 = vpow2.f32 %v193_v61  ;;  %v192_v63 = vsub.f32 0.0, %v187_v62  ;;  %v189_v14 = vadd.f32 %v188_v10, %v111_v6 }
 0x112   :  { %v195_v0 = vmul.f32 1.442695, %v192_v63 }
 0x114   :  { %401 = vpow2.f32 %v195_v0 }
 0x11d   :  { %v400_v1 = vpop.eup %399 }
 0x11e   :  { %v197_v2 = vadd.f32 1.0, %v400_v1 }
 0x120   :  { %403 = vrcp.f32 %v197_v2 }
 0x121   :  { %v402_v3 = vpop.eup %401 }
 0x122   :  { %v198_v4 = vadd.f32 1.0, %v402_v3 }
 0x124   :  { %405 = vrcp.f32 %v198_v4 }
 0x12d   :  { %v404_v7 = vpop.eup %403 }
 0x12e   :  { %v201_v9 = vmul.f32 %v404_v7, %v181_v57 }
 0x130   :  { %v203_v11 = vmul.f32 %v201_v9, %v183_v8 }
 0x131   :  { %v406_v12 = vpop.eup %405 }
 0x132   :  { %v202_v13 = vmul.f32 %v406_v12, %v187_v62  ;;  %387 = vmatprep.mubr.f32.mxu1 %v203_v11 }
 0x134   :  { %v204_v15 = vmul.f32 %v202_v13, %v189_v14 }
 0x136   :  { %388 = vmatmul.mubr.f32.vlgmr.msra.gmra.mxu1 %v204_v15 }
 0x1f6   :  { %v389_v17 = vpop.f32.mrf.mxu1 }
 0x1f7   :  { %v315_v18 = vadd.f32 %v389_v17, %v336_v16 }
 0x1f8   :  { %v289_v19 = vpop.f32.mrf.mxu1 }
 0x1f9   :  { %317 = vst [vmem:[#allocation9 + $0x8] sm:$0xff] %v315_v18  ;;  %v314_v20 = vadd.f32 %v336_v16, %v289_v19 }
 0x1fb   :  { %316 = vst [vmem:[#allocation9] sm:$0xff] %v314_v20 }
 0x1fc   :  { %478 = shalt.err (!%p475_p5)
}
 0x1fd   :  { %329 = dma.vmem_to_hbm [thread:$0]  %s324_s13, 256, %s566_s5, [#allocation5], %s497_s28, %s497_s28, %s498_s29  }
 0x1fe   :  { %491 = dma.done.wait [#allocation5], 256  }
 0x1ff   :  { %492 = vsyncadd [#allocation5], 4294967040 }
 0x200   :  { %333 = vsyncpa [#allocation4], 1 }
 0x201   :  { %334 = vsyncpa [#allocation7], 1 }
 0x202   :  { %335 = vsyncpa [#allocation5], 1 }

</bundles_post_ra>
